<compile_context>
chip_gen: v6e
topology: v6e:2x2x1
jax: 0.10.0
libtpu: 0.0.40
codegen_flags: <defaults>
</compile_context>

<pallas_src>
import numpy as np
import jax
import jax.numpy as jnp
from jax.experimental import pallas as pl
from jax.experimental.pallas import tpu as pltpu

INPUT_DIM = 16
HIDDEN_DIM = 32
OUTPUT_DIM = 4
BATCH = 8
BN_EPS = 1e-5

H = HIDDEN_DIM                 # 32
H2 = 2 * HIDDEN_DIM            # 64  (bidirectional width)
GATES_LIVE = 3 * H2            # 192: [i_f,i_b | o_f,o_b | g_f,g_b], f dropped

# ---- narrow-K slab (contraction dim <= 32): emb+res, layer-0 gates, fc2 ----
SEG_A = 0                      # x @ [W_emb*s1 | 0 | W_res]
A_WIDTH = 256                  # emb in cols 0:32, res lane-aligned at 128:192
RES_OFF = 128
SEG_L0 = SEG_A + A_WIDTH       # 256: layer-0 fused live gates (192 used)
SEG_F2 = SEG_L0 + 256          # 512: fc2 (OUTPUT_DIM used)
W32_COLS = SEG_F2 + 128        # 640
W32_ROWS = H                   # 32 (emb/res use rows 0:16)

# ---- wide-K slab (contraction dim == 64): layer-1 gates, fc1 ---------------
SEG_L1 = 0                     # layer-1 fused live gates (192 used)
SEG_F1 = SEG_L1 + 256          # 256: fc1 (H used)
W64_COLS = SEG_F1 + 128        # 384
W64_ROWS = H2                  # 64


def _round_up(n, m):
    return ((n + m - 1) // m) * m


# ----------------------------------------------------------------------------
# Kernel: whole forward pass on one batch tile.  Weights are two bf16 VMEM
# slabs (biases f32), sliced with static, 128-lane-aligned views.
# ----------------------------------------------------------------------------
def attn_bilstm_kernel(x_ref, w32_ref, b32_ref, w64_ref, b64_ref, out_ref):
    x = x_ref[...].astype(jnp.bfloat16)                      # (bb, INPUT_DIM)

    # --- fused x @ [W_emb (BN1 scale folded) | 0 | W_res] -------------------
    t_a = (jnp.dot(x, w32_ref[0:INPUT_DIM, SEG_A:SEG_A + A_WIDTH],
                   preferred_element_type=jnp.float32)
           + b32_ref[:, SEG_A:SEG_A + A_WIDTH])
    e = jnp.maximum(t_a[:, 0:H], 0.0)        # embedding -> ReLU (BN1 shift folded into L0 bias)
    res = t_a[:, RES_OFF:RES_OFF + H2]       # residual projection (lane-0 aligned)

    def bilstm_step(inp, w_ref, b_ref, k_dim, seg):
        # Single-timestep bidirectional LSTM cell from zero state.
        # Live-gate layout [i_f,i_b | o_f,o_b | g_f,g_b]; the f-gate columns
        # are not even stored (f * c0 == 0 exactly).
        gates = (jnp.dot(inp.astype(jnp.bfloat16),
                         w_ref[0:k_dim, seg:seg + GATES_LIVE],
                         preferred_element_type=jnp.float32)
                 + b_ref[:, seg:seg + GATES_LIVE])
        i = jax.nn.sigmoid(gates[:, 0 * H2:1 * H2])
        o = jax.nn.sigmoid(gates[:, 1 * H2:2 * H2])
        g = jnp.tanh(gates[:, 2 * H2:3 * H2])
        return o * jnp.tanh(i * g)           # (bb, 2H), already [fwd | bwd]

    l0 = bilstm_step(e, w32_ref, b32_ref, H, SEG_L0)
    lstm_out = bilstm_step(l0, w64_ref, b64_ref, H2, SEG_L1) + res

    # Attention over a length-1 sequence: softmax == 1 exactly -> context == lstm_out.
    # (dead branch removed; see reference_forward for the full math)

    # --- fc head: Linear -> ReLU (BN2 folded) -> Linear ---------------------
    y = (jnp.dot(lstm_out.astype(jnp.bfloat16),
                 w64_ref[0:H2, SEG_F1:SEG_F1 + H],
                 preferred_element_type=jnp.float32)
         + b64_ref[:, SEG_F1:SEG_F1 + H])
    y = jnp.maximum(y, 0.0)                  # BN2 scale folded into fc1; shift into fc2 bias

    out = (jnp.dot(y.astype(jnp.bfloat16),
                   w32_ref[0:H, SEG_F2:SEG_F2 + OUTPUT_DIM],
                   preferred_element_type=jnp.float32)
           + b32_ref[:, SEG_F2:SEG_F2 + OUTPUT_DIM])
    out_ref[...] = out


def _choose_batch_tile(B, block_b):
    # Small batches: one grid step (weight DMA + fixed call overhead dominate).
    if B <= 512:
        return B
    # Large batches: >=2 steps so v7x's two TensorCores both get work; tile is
    # capped (intermediates ~6 KB/row f32) so it fits v7x's 64 MiB VMEM and
    # v5e's raised scoped limit with headroom.
    bb = min(block_b, _round_up(pl.cdiv(B, 2), 8))
    return min(_round_up(bb, 8), 2048)


def attention_bilstm(x, w32, b32, w64, b64, *, block_b=1024):
    """x: (B, INPUT_DIM) f32; w32/w64: bf16 weight slabs; b32/b64: f32 bias slabs."""
    B = x.shape[0]
    bb = _choose_batch_tile(B, block_b)
    B_pad = pl.cdiv(B, bb) * bb
    if B_pad != B:                       # ragged batch: pad, compute, slice off
        x = jnp.pad(x, ((0, B_pad - B), (0, 0)))
    grid = (B_pad // bb,)

    out = pl.pallas_call(
        attn_bilstm_kernel,
        out_shape=jax.ShapeDtypeStruct((B_pad, OUTPUT_DIM), jnp.float32),
        grid=grid,
        in_specs=[
            pl.BlockSpec((bb, INPUT_DIM), lambda i: (i, 0)),
            pl.BlockSpec((W32_ROWS, W32_COLS), lambda i: (0, 0)),  # weights stay VMEM-resident
            pl.BlockSpec((1, W32_COLS), lambda i: (0, 0)),
            pl.BlockSpec((W64_ROWS, W64_COLS), lambda i: (0, 0)),
            pl.BlockSpec((1, W64_COLS), lambda i: (0, 0)),
        ],
        out_specs=pl.BlockSpec((bb, OUTPUT_DIM), lambda i: (i, 0)),
        compiler_params=pltpu.CompilerParams(
            dimension_semantics=("parallel",),
            # Raise v5e's 16 MiB scoped default; matches v6e/v7x default and is
            # well under every generation's physical VMEM for bb <= 2048.
            vmem_limit_bytes=32 * 1024 * 1024),
    )(x, w32, b32, w64, b64)
    return out[:B] if B_pad != B else out


# ----------------------------------------------------------------------------
# Deterministic raw parameters (PyTorch-equivalent, eval mode, random BN stats),
# reference math, and host-side packing (BN folding + direction fusion + slabs).
# ----------------------------------------------------------------------------
def _uniform(key, shape, fan_in):
    bound = 1.0 / np.sqrt(fan_in)
    return jax.random.uniform(key, shape, jnp.float32, -bound, bound)


def init_raw_params(key):
    ks = iter(jax.random.split(key, 48))

    def linear(din, dout):
        w = _uniform(next(ks), (dout, din), din)      # PyTorch (out, in)
        b = _uniform(next(ks), (dout,), din)
        return w.T, b                                 # (in, out), (out,)

    def lstm_dir(din):
        # weight_ih (4H,din), bias_ih, bias_hh; gate order [i,f,g,o].
        # weight_hh omitted: exact for seq_len==1 with zero initial state.
        w_ih = _uniform(next(ks), (4 * H, din), H)
        b_ih = _uniform(next(ks), (4 * H,), H)
        b_hh = _uniform(next(ks), (4 * H,), H)
        return w_ih.T, b_ih + b_hh

    def bn_stats():
        # Random running stats so the shift-folding paths are actually exercised.
        gamma = jax.random.uniform(next(ks), (H,), jnp.float32, 0.5, 1.5)
        beta = 0.2 * jax.random.normal(next(ks), (H,), jnp.float32)
        mean = 0.2 * jax.random.normal(next(ks), (H,), jnp.float32)
        var = jax.random.uniform(next(ks), (H,), jnp.float32, 0.5, 1.5)
        return gamma, beta, mean, var

    p = {}
    p["w_emb"], p["b_emb"] = linear(INPUT_DIM, H)
    p["bn1_gamma"], p["bn1_beta"], p["bn1_mean"], p["bn1_var"] = bn_stats()
    p["w_l0f"], p["b_l0f"] = lstm_dir(H)
    p["w_l0b"], p["b_l0b"] = lstm_dir(H)
    p["w_l1f"], p["b_l1f"] = lstm_dir(H2)
    p["w_l1b"], p["b_l1b"] = lstm_dir(H2)
    p["w_res"], p["b_res"] = linear(INPUT_DIM, H2)
    p["w_a1"], p["b_a1"] = linear(H2, H)      # attention params exist in the module,
    p["w_a2"], p["b_a2"] = linear(H, 1)       # but are provably dead for seq_len==1
    p["w_f1"], p["b_f1"] = linear(H2, H)
    p["bn2_gamma"], p["bn2_beta"], p["bn2_mean"], p["bn2_var"] = bn_stats()
    p["w_f2"], p["b_f2"] = linear(H, OUTPUT_DIM)
    return p


def pack_params(p):
    def bn_fold(prefix):
        s = p[prefix + "_gamma"] / jnp.sqrt(p[prefix + "_var"] + BN_EPS)
        sh = p[prefix + "_beta"] - p[prefix + "_mean"] * s
        return s, sh

    s1, sh1 = bn_fold("bn1")       # s1, s2 > 0 -> ReLU/scale commute is exact
    s2, sh2 = bn_fold("bn2")

    def fuse_dirs_live(w_f, w_b, b_f, b_b):
        # Live-gate, lane-friendly layout [i_f,i_b | o_f,o_b | g_f,g_b]
        # (PyTorch gate order is [i, f, g, o]; the f-gate is dropped).
        wcols, bcols = [], []
        for gi in (0, 3, 2):
            wcols += [w_f[:, gi * H:(gi + 1) * H], w_b[:, gi * H:(gi + 1) * H]]
            bcols += [b_f[gi * H:(gi + 1) * H], b_b[gi * H:(gi + 1) * H]]
        return jnp.concatenate(wcols, axis=1), jnp.concatenate(bcols)

    w_l0, b_l0 = fuse_dirs_live(p["w_l0f"], p["w_l0b"], p["b_l0f"], p["b_l0b"])
    w_l1, b_l1 = fuse_dirs_live(p["w_l1f"], p["w_l1b"], p["b_l1f"], p["b_l1b"])

    # BN1: scale into embedding Linear, shift into layer-0 gate bias.
    w_emb_s = p["w_emb"] * s1[None, :]
    b_emb_s = p["b_emb"] * s1
    b_l0 = b_l0 + sh1 @ w_l0
    # BN2: scale into fc1, shift into fc2 bias.
    w_f1_s = p["w_f1"] * s2[None, :]
    b_f1_s = p["b_f1"] * s2
    b_f2_f = p["b_f2"] + sh2 @ p["w_f2"]

    w32 = jnp.zeros((W32_ROWS, W32_COLS), jnp.float32)
    b32 = jnp.zeros((1, W32_COLS), jnp.float32)
    w64 = jnp.zeros((W64_ROWS, W64_COLS), jnp.float32)
    b64 = jnp.zeros((1, W64_COLS), jnp.float32)

    w32 = w32.at[:INPUT_DIM, SEG_A:SEG_A + H].set(w_emb_s)
    b32 = b32.at[0, SEG_A:SEG_A + H].set(b_emb_s)
    w32 = w32.at[:INPUT_DIM, SEG_A + RES_OFF:SEG_A + RES_OFF + H2].set(p["w_res"])
    b32 = b32.at[0, SEG_A + RES_OFF:SEG_A + RES_OFF + H2].set(p["b_res"])

    w32 = w32.at[:H, SEG_L0:SEG_L0 + GATES_LIVE].set(w_l0)
    b32 = b32.at[0, SEG_L0:SEG_L0 + GATES_LIVE].set(b_l0)
    w64 = w64.at[:H2, SEG_L1:SEG_L1 + GATES_LIVE].set(w_l1)
    b64 = b64.at[0, SEG_L1:SEG_L1 + GATES_LIVE].set(b_l1)

    w64 = w64.at[:H2, SEG_F1:SEG_F1 + H].set(w_f1_s)
    b64 = b64.at[0, SEG_F1:SEG_F1 + H].set(b_f1_s)
    w32 = w32.at[:H, SEG_F2:SEG_F2 + OUTPUT_DIM].set(p["w_f2"])
    b32 = b32.at[0, SEG_F2:SEG_F2 + OUTPUT_DIM].set(b_f2_f)

    # Weights bf16 (MXU-native, half the DMA); biases stay f32 (negligible bytes).
    return (w32.astype(jnp.bfloat16), b32, w64.astype(jnp.bfloat16), b64)


def reference_forward(x, p):
    """Pure-JAX, unfused f32 replica of the PyTorch module in eval mode (including
    the attention softmax over the length-1 sequence axis)."""
    def bn(v, prefix):
        s = p[prefix + "_gamma"] / jnp.sqrt(p[prefix + "_var"] + BN_EPS)
        return (v - p[prefix + "_mean"]) * s + p[prefix + "_beta"]

    def cell(inp, w, b):
        g = inp @ w + b
        i = jax.nn.sigmoid(g[:, 0 * H:1 * H])
        gg = jnp.tanh(g[:, 2 * H:3 * H])
        o = jax.nn.sigmoid(g[:, 3 * H:4 * H])
        return o * jnp.tanh(i * gg)          # f*c0 == 0 for zero initial state

    e = bn(jnp.maximum(x @ p["w_emb"] + p["b_emb"], 0.0), "bn1")
    l0 = jnp.concatenate([cell(e, p["w_l0f"], p["b_l0f"]),
                          cell(e, p["w_l0b"], p["b_l0b"])], axis=-1)
    lo = jnp.concatenate([cell(l0, p["w_l1f"], p["b_l1f"]),
                          cell(l0, p["w_l1b"], p["b_l1b"])], axis=-1)
    lo = lo + (x @ p["w_res"] + p["b_res"])
    a = jnp.tanh(lo @ p["w_a1"] + p["b_a1"])
    score = a @ p["w_a2"] + p["b_a2"]                    # (B, 1)
    attn = jax.nn.softmax(score[:, :, None], axis=1)     # softmax over seq dim (len 1)
    ctx = jnp.sum(attn * lo[:, None, :], axis=1)         # == lo
    y = bn(jnp.maximum(ctx @ p["w_f1"] + p["b_f1"], 0.0), "bn2")
    return y @ p["w_f2"] + p["b_f2"]


if __name__ == "__main__":
    key = jax.random.PRNGKey(0)
    kx, kp, kx2 = jax.random.split(key, 3)

    raw = init_raw_params(kp)
    slabs = pack_params(raw)

    # bf16 weights/activations in the dots -> loosened tolerance vs f32 reference
    # (deliberate accuracy/bandwidth trade per perf review).
    ATOL = RTOL = 5e-2

    # Small batch (module-sized): single grid step.
    x = jax.random.normal(kx, (BATCH, INPUT_DIM), jnp.float32)
    out = jax.block_until_ready(attention_bilstm(x, *slabs))
    ref = reference_forward(x, raw)
    assert out.shape == (BATCH, OUTPUT_DIM)
    assert np.allclose(np.asarray(out), np.asarray(ref), atol=ATOL, rtol=RTOL)

    # Larger ragged batch: exercises the multi-step "parallel" grid and pad path.
    B2 = 612
    x2 = jax.random.normal(kx2, (B2, INPUT_DIM), jnp.float32)
    out2 = jax.block_until_ready(attention_bilstm(x2, *slabs))
    ref2 = reference_forward(x2, raw)
    assert out2.shape == (B2, OUTPUT_DIM)
    assert np.allclose(np.asarray(out2), np.asarray(ref2), atol=ATOL, rtol=RTOL)

    print("KERNEL_OK")
</pallas_src>

<mosaic_0001>
module attributes {stable_mosaic.version = 11 : i64} {
  func.func @attn_bilstm_kernel(%arg0: i32, %arg1: memref<8x16xf32, #tpu.memory_space<vmem>>, %arg2: memref<32x640xbf16, #tpu.memory_space<vmem>>, %arg3: memref<1x640xf32, #tpu.memory_space<vmem>>, %arg4: memref<64x384xbf16, #tpu.memory_space<vmem>>, %arg5: memref<1x384xf32, #tpu.memory_space<vmem>>, %arg6: memref<8x4xf32, #tpu.memory_space<vmem>>) attributes {dimension_semantics = [#tpu.dimension_semantics<parallel>], iteration_bounds = array<i64: 1>, scalar_prefetch = 0 : i64, scratch_operands = 0 : i64, tpu.core_type = #tpu.core_type<tc>, window_params = [{transform_indices = @transform_0, window_bounds = array<i64: 8, 16>}, {pipeline_mode = #tpu.pipeline_mode<synchronous>, transform_indices = @transform_1, window_bounds = array<i64: 32, 640>}, {pipeline_mode = #tpu.pipeline_mode<synchronous>, transform_indices = @transform_2, window_bounds = array<i64: 1, 640>}, {pipeline_mode = #tpu.pipeline_mode<synchronous>, transform_indices = @transform_3, window_bounds = array<i64: 64, 384>}, {pipeline_mode = #tpu.pipeline_mode<synchronous>, transform_indices = @transform_4, window_bounds = array<i64: 1, 384>}, {transform_indices = @transform_5, window_bounds = array<i64: 8, 4>}]} {
    %c0 = arith.constant 0 : index
    %c0_0 = arith.constant 0 : index
    %0 = vector.load %arg1[%c0, %c0_0] : memref<8x16xf32, #tpu.memory_space<vmem>>, vector<8x16xf32>
    %1 = arith.truncf %0 : vector<8x16xf32> to vector<8x16xbf16>
    %c0_1 = arith.constant 0 : index
    %c0_2 = arith.constant 0 : index
    %2 = vector.load %arg2[%c0_1, %c0_2] : memref<32x640xbf16, #tpu.memory_space<vmem>>, vector<16x256xbf16>
    %cst = arith.constant dense<0.000000e+00> : vector<8x256xf32>
    %3 = tpu.matmul %1, %2, %cst {dimension_numbers = #tpu.dot_dimension_numbers<[1], [0], [0], [1], [0, 0, 1, 1], [], []>} : vector<8x16xbf16>, vector<16x256xbf16>, vector<8x256xf32> -> vector<8x256xf32>
    %c0_3 = arith.constant 0 : index
    %c0_4 = arith.constant 0 : index
    %4 = vector.load %arg3[%c0_3, %c0_4] : memref<1x640xf32, #tpu.memory_space<vmem>>, vector<1x256xf32>
    %5 = vector.broadcast %4 : vector<1x256xf32> to vector<8x256xf32>
    %6 = arith.addf %3, %5 : vector<8x256xf32>
    %7 = vector.extract_strided_slice %6 {offsets = [0, 0], sizes = [8, 32], strides = [1, 1]} : vector<8x256xf32> to vector<8x32xf32>
    %cst_5 = arith.constant 0.000000e+00 : f32
    %8 = vector.broadcast %cst_5 : f32 to vector<8x32xf32>
    %9 = arith.maximumf %7, %8 : vector<8x32xf32>
    %10 = vector.extract_strided_slice %6 {offsets = [0, 128], sizes = [8, 64], strides = [1, 1]} : vector<8x256xf32> to vector<8x64xf32>
    %11 = arith.truncf %9 : vector<8x32xf32> to vector<8x32xbf16>
    %c0_6 = arith.constant 0 : index
    %c256 = arith.constant 256 : index
    %12 = vector.load %arg2[%c0_6, %c256] : memref<32x640xbf16, #tpu.memory_space<vmem>>, vector<32x192xbf16>
    %cst_7 = arith.constant dense<0.000000e+00> : vector<8x192xf32>
    %13 = tpu.matmul %11, %12, %cst_7 {dimension_numbers = #tpu.dot_dimension_numbers<[1], [0], [0], [1], [0, 0, 1, 1], [], []>} : vector<8x32xbf16>, vector<32x192xbf16>, vector<8x192xf32> -> vector<8x192xf32>
    %c0_8 = arith.constant 0 : index
    %c256_9 = arith.constant 256 : index
    %14 = vector.load %arg3[%c0_8, %c256_9] : memref<1x640xf32, #tpu.memory_space<vmem>>, vector<1x192xf32>
    %15 = vector.broadcast %14 : vector<1x192xf32> to vector<8x192xf32>
    %16 = arith.addf %13, %15 : vector<8x192xf32>
    %17 = vector.extract_strided_slice %16 {offsets = [0, 0], sizes = [8, 64], strides = [1, 1]} : vector<8x192xf32> to vector<8x64xf32>
    %18 = arith.negf %17 : vector<8x64xf32>
    %19 = math.exp %18 : vector<8x64xf32>
    %cst_10 = arith.constant 1.000000e+00 : f32
    %20 = vector.broadcast %cst_10 : f32 to vector<8x64xf32>
    %21 = arith.addf %20, %19 : vector<8x64xf32>
    %22 = arith.divf %20, %21 : vector<8x64xf32>
    %23 = vector.extract_strided_slice %16 {offsets = [0, 64], sizes = [8, 64], strides = [1, 1]} : vector<8x192xf32> to vector<8x64xf32>
    %24 = arith.negf %23 : vector<8x64xf32>
    %25 = math.exp %24 : vector<8x64xf32>
    %cst_11 = arith.constant 1.000000e+00 : f32
    %26 = vector.broadcast %cst_11 : f32 to vector<8x64xf32>
    %27 = arith.addf %26, %25 : vector<8x64xf32>
    %28 = arith.divf %26, %27 : vector<8x64xf32>
    %29 = vector.extract_strided_slice %16 {offsets = [0, 128], sizes = [8, 64], strides = [1, 1]} : vector<8x192xf32> to vector<8x64xf32>
    %30 = math.tanh %29 : vector<8x64xf32>
    %31 = arith.mulf %22, %30 : vector<8x64xf32>
    %32 = math.tanh %31 : vector<8x64xf32>
    %33 = arith.mulf %28, %32 : vector<8x64xf32>
    %34 = arith.truncf %33 : vector<8x64xf32> to vector<8x64xbf16>
    %c0_12 = arith.constant 0 : index
    %c0_13 = arith.constant 0 : index
    %35 = vector.load %arg4[%c0_12, %c0_13] : memref<64x384xbf16, #tpu.memory_space<vmem>>, vector<64x192xbf16>
    %cst_14 = arith.constant dense<0.000000e+00> : vector<8x192xf32>
    %36 = tpu.matmul %34, %35, %cst_14 {dimension_numbers = #tpu.dot_dimension_numbers<[1], [0], [0], [1], [0, 0, 1, 1], [], []>} : vector<8x64xbf16>, vector<64x192xbf16>, vector<8x192xf32> -> vector<8x192xf32>
    %c0_15 = arith.constant 0 : index
    %c0_16 = arith.constant 0 : index
    %37 = vector.load %arg5[%c0_15, %c0_16] : memref<1x384xf32, #tpu.memory_space<vmem>>, vector<1x192xf32>
    %38 = vector.broadcast %37 : vector<1x192xf32> to vector<8x192xf32>
    %39 = arith.addf %36, %38 : vector<8x192xf32>
    %40 = vector.extract_strided_slice %39 {offsets = [0, 0], sizes = [8, 64], strides = [1, 1]} : vector<8x192xf32> to vector<8x64xf32>
    %41 = arith.negf %40 : vector<8x64xf32>
    %42 = math.exp %41 : vector<8x64xf32>
    %cst_17 = arith.constant 1.000000e+00 : f32
    %43 = vector.broadcast %cst_17 : f32 to vector<8x64xf32>
    %44 = arith.addf %43, %42 : vector<8x64xf32>
    %45 = arith.divf %43, %44 : vector<8x64xf32>
    %46 = vector.extract_strided_slice %39 {offsets = [0, 64], sizes = [8, 64], strides = [1, 1]} : vector<8x192xf32> to vector<8x64xf32>
    %47 = arith.negf %46 : vector<8x64xf32>
    %48 = math.exp %47 : vector<8x64xf32>
    %cst_18 = arith.constant 1.000000e+00 : f32
    %49 = vector.broadcast %cst_18 : f32 to vector<8x64xf32>
    %50 = arith.addf %49, %48 : vector<8x64xf32>
    %51 = arith.divf %49, %50 : vector<8x64xf32>
    %52 = vector.extract_strided_slice %39 {offsets = [0, 128], sizes = [8, 64], strides = [1, 1]} : vector<8x192xf32> to vector<8x64xf32>
    %53 = math.tanh %52 : vector<8x64xf32>
    %54 = arith.mulf %45, %53 : vector<8x64xf32>
    %55 = math.tanh %54 : vector<8x64xf32>
    %56 = arith.mulf %51, %55 : vector<8x64xf32>
    %57 = arith.addf %56, %10 : vector<8x64xf32>
    %58 = arith.truncf %57 : vector<8x64xf32> to vector<8x64xbf16>
    %c0_19 = arith.constant 0 : index
    %c256_20 = arith.constant 256 : index
    %59 = vector.load %arg4[%c0_19, %c256_20] : memref<64x384xbf16, #tpu.memory_space<vmem>>, vector<64x32xbf16>
    %cst_21 = arith.constant dense<0.000000e+00> : vector<8x32xf32>
    %60 = tpu.matmul %58, %59, %cst_21 {dimension_numbers = #tpu.dot_dimension_numbers<[1], [0], [0], [1], [0, 0, 1, 1], [], []>} : vector<8x64xbf16>, vector<64x32xbf16>, vector<8x32xf32> -> vector<8x32xf32>
    %c0_22 = arith.constant 0 : index
    %c256_23 = arith.constant 256 : index
    %61 = vector.load %arg5[%c0_22, %c256_23] : memref<1x384xf32, #tpu.memory_space<vmem>>, vector<1x32xf32>
    %62 = vector.broadcast %61 : vector<1x32xf32> to vector<8x32xf32>
    %63 = arith.addf %60, %62 : vector<8x32xf32>
    %cst_24 = arith.constant 0.000000e+00 : f32
    %64 = vector.broadcast %cst_24 : f32 to vector<8x32xf32>
    %65 = arith.maximumf %63, %64 : vector<8x32xf32>
    %66 = arith.truncf %65 : vector<8x32xf32> to vector<8x32xbf16>
    %c0_25 = arith.constant 0 : index
    %c512 = arith.constant 512 : index
    %67 = vector.load %arg2[%c0_25, %c512] : memref<32x640xbf16, #tpu.memory_space<vmem>>, vector<32x4xbf16>
    %cst_26 = arith.constant dense<0.000000e+00> : vector<8x4xf32>
    %68 = tpu.matmul %66, %67, %cst_26 {dimension_numbers = #tpu.dot_dimension_numbers<[1], [0], [0], [1], [0, 0, 1, 1], [], []>} : vector<8x32xbf16>, vector<32x4xbf16>, vector<8x4xf32> -> vector<8x4xf32>
    %c0_27 = arith.constant 0 : index
    %c512_28 = arith.constant 512 : index
    %69 = vector.load %arg3[%c0_27, %c512_28] : memref<1x640xf32, #tpu.memory_space<vmem>>, vector<1x4xf32>
    %70 = vector.broadcast %69 : vector<1x4xf32> to vector<8x4xf32>
    %71 = arith.addf %68, %70 : vector<8x4xf32>
    %c0_29 = arith.constant 0 : index
    %c0_30 = arith.constant 0 : index
    %72 = vector.load %arg6[%c0_29, %c0_30] : memref<8x4xf32, #tpu.memory_space<vmem>>, vector<8x4xf32>
    tpu.vector_store %arg6[%c0_29, %c0_30], %71 {strides = array<i32>} : memref<8x4xf32, #tpu.memory_space<vmem>>, vector<8x4xf32>,
    return
  }
  func.func @transform_0(%arg0: i32) -> (i32, i32) {
    %c0_i32 = arith.constant 0 : i32
    %c0_i32_0 = arith.constant 0 : i32
    return %arg0, %c0_i32 : i32, i32
  }
  func.func @transform_1(%arg0: i32) -> (i32, i32) {
    %c0_i32 = arith.constant 0 : i32
    %c0_i32_0 = arith.constant 0 : i32
    %c0_i32_1 = arith.constant 0 : i32
    return %c0_i32, %c0_i32_0 : i32, i32
  }
  func.func @transform_2(%arg0: i32) -> (i32, i32) {
    %c0_i32 = arith.constant 0 : i32
    %c0_i32_0 = arith.constant 0 : i32
    %c0_i32_1 = arith.constant 0 : i32
    return %c0_i32, %c0_i32_0 : i32, i32
  }
  func.func @transform_3(%arg0: i32) -> (i32, i32) {
    %c0_i32 = arith.constant 0 : i32
    %c0_i32_0 = arith.constant 0 : i32
    %c0_i32_1 = arith.constant 0 : i32
    return %c0_i32, %c0_i32_0 : i32, i32
  }
  func.func @transform_4(%arg0: i32) -> (i32, i32) {
    %c0_i32 = arith.constant 0 : i32
    %c0_i32_0 = arith.constant 0 : i32
    %c0_i32_1 = arith.constant 0 : i32
    return %c0_i32, %c0_i32_0 : i32, i32
  }
  func.func @transform_5(%arg0: i32) -> (i32, i32) {
    %c0_i32 = arith.constant 0 : i32
    %c0_i32_0 = arith.constant 0 : i32
    return %arg0, %c0_i32 : i32, i32
  }
}

</mosaic_0001>

<bundles_post_ra>
// kernel: tpu_custom_call.1
= control target key start
LH: loop header
LB: loop body
LE: loop exit
PB: predicated region body
PF: predicated region fallthrough
CT: control target
= control target key end

     0   :  { %10 = vsyncpa [#allocation3], 0  ;;  %s813_s0 = inlined_call_operand.hbm [shape: f32[8,16], index: 0, kind: input, shape index: {}]   ;;  %s814_s1 = inlined_call_operand.hbm [shape: bf16[32,640], index: 1, kind: input, shape index: {}]   ;;  %s815_s2 = inlined_call_operand.hbm [shape: f32[1,640], index: 2, kind: input, shape index: {}]   ;;  %s816_s3 = inlined_call_operand.hbm [shape: bf16[64,384], index: 3, kind: input, shape index: {}]   ;;  %s817_s4 = inlined_call_operand.vmem [shape: f32[1,384], index: 4, kind: input, shape index: {}]   ;;  %s818_s5 = inlined_call_operand.vmem [shape: f32[8,4], index: 5, kind: output, shape index: {}]  }
   0x1   :  { %11 = vsyncpa [#allocation5], 0 }
   0x2   :  { %12 = vsyncpa [#allocation8], 0  ;;  %s729_s18 = smov [#allocation4]  }
   0x3   :  { %s28_s19 = sshll.u32 %s729_s18, 4  ;;  %s29_s19 = int_to_ptr.vmem [resolvable:$true] %s28_s19 }
   0x4   :  { %s651_s20 = scalar_lea.vmem %s29_s19, 1280  ;;  %p656_p1 = scmp.lt.s32.totalorder %s29_s19, %s29_s19 }
   0x5   :  { %p652_p0 = scmp.ne.s32.totalorder %s29_s19, %s651_s20  ;;  %p657_p2 = scmp.lt.s32.totalorder %s651_s20, %s651_s20 }
   0x7   :  { %p658_p3 = por %p657_p2, %p656_p1 }
   0x9   :  { %p659_p4 = pnand %p658_p3, %p652_p0 }
   0xb   :  { %662 = shalt.err (!%p659_p4)
}
   0xc   :  { %s730_s21 = smov 320   ;;  %s731_s22 = smov 20  }
   0xd   :  { %34 = dma.hbm_to_vmem [thread:$0]  %s814_s1, 1280, %s29_s19, [#allocation5], %s730_s21, %s730_s21, %s731_s22  }
   0xe   :  { %s732_s25 = smov [#allocation2]   ;;  %s733_s27 = smov [#allocation6]  }
   0xf   :  { %s19_s26 = sshll.u32 %s732_s25, 4  ;;  %s41_s28 = sshll.u32 %s733_s27, 4  ;;  %s20_s26 = int_to_ptr.vmem [resolvable:$true] %s19_s26  ;;  %s42_s28 = int_to_ptr.vmem [resolvable:$true] %s41_s28 }
  0x10   :  { %s671_s29 = scalar_lea.vmem %s20_s26, 128  ;;  %p676_p6 = scmp.lt.s32.totalorder %s20_s26, %s20_s26 }
  0x11   :  { %p672_p5 = scmp.ne.s32.totalorder %s20_s26, %s671_s29  ;;  %p677_p7 = scmp.lt.s32.totalorder %s671_s29, %s671_s29 }
  0x13   :  { %p678_p8 = por %p677_p7, %p676_p6 }
  0x15   :  { %p679_p9 = pnand %p678_p8, %p672_p5 }
  0x17   :  { %682 = shalt.err (!%p679_p9)
}
  0x18   :  { %22 = dma.hbm_to_vmem [thread:$0]  %s813_s0, 128, %s20_s26, [#allocation3]  }
  0x19   :  { %s691_s7 = scalar_lea.vmem %s42_s28, 80  ;;  %s695_s1 = scalar_lea.vmem %s42_s28, 96 }
  0x1a   :  { %p692_p10 = scmp.ne.s32.totalorder %s42_s28, %s691_s7  ;;  %p696_p11 = scmp.lt.s32.totalorder %s42_s28, %s42_s28 }
  0x1b   :  { %p697_p12 = scmp.lt.s32.totalorder %s695_s1, %s691_s7 }
  0x1d   :  { %p698_p13 = por %p697_p12, %p696_p11 }
  0x1f   :  { %p699_p0 = pnand %p698_p13, %p692_p10 }
  0x21   :  { %702 = shalt.err (!%p699_p0)
}
  0x22   :  { %44 = dma.hbm_to_vmem [thread:$0]  %s815_s2, 80, %s42_s28, [#allocation5]  }
  0x23   :  { %s734_s10 = smov [#allocation7]  }
  0x24   :  { %s50_s11 = sshll.u32 %s734_s10, 4  ;;  %s51_s11 = int_to_ptr.vmem [resolvable:$true] %s50_s11 }
  0x25   :  { %s711_s12 = scalar_lea.vmem %s51_s11, 1536  ;;  %p716_p2 = scmp.lt.s32.totalorder %s51_s11, %s51_s11 }
  0x26   :  { %p712_p1 = scmp.ne.s32.totalorder %s51_s11, %s711_s12  ;;  %p717_p3 = scmp.lt.s32.totalorder %s711_s12, %s711_s12 }
  0x28   :  { %p718_p4 = por %p717_p3, %p716_p2 }
  0x2a   :  { %p719_p5 = pnand %p718_p4, %p712_p1 }
  0x2c   :  { %722 = shalt.err (!%p719_p5)
}
  0x2d   :  { %s735_s0 = smov 192   ;;  %s736_s13 = smov 12  }
  0x2e   :  { %56 = dma.hbm_to_vmem [thread:$0]  %s816_s3, 1536, %s51_s11, [#allocation8], %s735_s0, %s735_s0, %s736_s13  }
  0x2f   :  { %723 = dma.done.wait [#allocation3], 128  }
  0x30   :  { %724 = vsyncadd [#allocation3], 4294967168 }
  0x31   :  { %725 = dma.done.wait [#allocation5], 1360  }
  0x32   :  { %726 = vsyncadd [#allocation5], 4294965936 }
  0x33   :  { %727 = dma.done.wait [#allocation8], 1536  }
  0x34   :  { %728 = vsyncadd [#allocation8], 4294965760  ;;  %v737_v0 = vmov 0   ;;  %v600_v1 = vld [vmem:[#allocation4 + $0x4] ss:$20 sps:$4 sm:$0xff]   ;;  %vm98_vm0 = vcmask 130048   ;;  %v78_v9 = vlaneseq }
  0x35   :  { %134 = vmatprep.mubr.bf16.mxu0 %v737_v0  ;;  %217 = vmatprep.mubr.bf16.mxu1 %v737_v0  ;;  %v602_v2 = vld [vmem:[#allocation4] ss:$20 sps:$4 sm:$0xff]   ;;  %v72_v3 = vld [vmem:[#allocation2] sm:$0xff]  ;;  %v605_v6 = vld [vmem:[#allocation4 + $0x30] ss:$20 sps:$4 sm:$0xff]   ;;  %vm181_vm1 = vcmask 261120  }
  0x36   :  { %116 = vmatprep.subr.bf16.mxu0 %v600_v1  ;;  %v73_v4 = vpack.c.bf16 %v72_v3, %v72_v3  ;;  %v603_v5 = vld [vmem:[#allocation4 + $0x34] ss:$20 sps:$4 sm:$0xff]   ;;  %v606_v7 = vld [vmem:[#allocation4 + $0xc] ss:$20 sps:$4 sm:$0xff]   ;;  %v79_v10 = vshrl.u32 %v78_v9, 7  ;;  %s738_s2 = smov 64  }
  0x37   :  { %117 = vmatpush1.bf16.msra.mxu0 %v602_v2  ;;  %197 = vmatprep.subr.bf16.mxu1 %v603_v5  ;;  %v608_v8 = vld [vmem:[#allocation4 + $0x8] ss:$20 sps:$4 sm:$0xff]   ;;  %v783_v12 = vld [vmem:[#allocation6] sm:$0x3]  ;;  %v149_v21 = vld [vmem:[#allocation6 + $0x2] sm:$0x3] }
  0x38   :  { %198 = vmatpush1.bf16.msra.mxu1 %v605_v6  ;;  %v80_v11 = vsub.s32 0, %v79_v10  ;;  %v789_v29 = vsub.s32 1, %v79_v10  ;;  %v609_v37 = vld [vmem:[#allocation7 + $0x48] ss:$12 sps:$4 sm:$0xff]   ;;  %v611_v38 = vld [vmem:[#allocation7 + $0x4c] ss:$12 sps:$4 sm:$0xff]  }
  0x39   :  { %199 = vmatprep.subr.bf16.mxu1 %v606_v7  ;;  %v614_v39 = vld [vmem:[#allocation7 + $0x34] ss:$12 sps:$4 sm:$0xff]   ;;  %316 = vmatprep.subr.bf16.mxu0 %v611_v38  ;;  %v612_v40 = vld [vmem:[#allocation7 + $0x30] ss:$12 sps:$4 sm:$0xff]   ;;  %v615_v42 = vld [vmem:[#allocation7 + $0x18] ss:$12 sps:$4 sm:$0xff]  }
  0x3a   :  { %533 = vmatmul.mubr.msk.bf16.vlgmr.msra.gmra.mxu0 %vm98_vm0, %v73_v4  ;;  %v81_v13 = vrot.slane %v783_v12, %v80_v11  ;;  %v154_v22 = vrot.slane %v149_v21, %v80_v11  ;;  %v158_v30 = vrot.slane %v149_v21, %v789_v29  ;;  %v617_v41 = vld [vmem:[#allocation7 + $0x1c] ss:$12 sps:$4 sm:$0xff]   ;;  %v620_v44 = vld [vmem:[#allocation7 + $0x4] ss:$12 sps:$4 sm:$0xff]   ;;  %v618_v45 = vld [vmem:[#allocation7] ss:$12 sps:$4 sm:$0xff]   ;;  %v85_v4 = vrot.slane %v783_v12, %v789_v29 }
  0x3b   :  { %340 = vmatprep.mubr.bf16.mxu0 %v737_v0  ;;  %317 = vmatpush1.bf16.msra.mxu0 %v609_v37  ;;  %vm304_vm2 = vcmask 523264   ;;  %v249_v50 = vld [vmem:[%s817_s4] sm:$0x3]  ;;  %v621_v1 = vld [vmem:[#allocation7 + $0x50] ss:$12 sps:$4 sm:$0xff]   ;;  %v739_v2 = vmov 0.0  }
  0x3c   :  { %200 = vmatpush1.bf16.msra.mxu1 %v608_v8  ;;  %318 = vmatprep.subr.bf16.mxu0 %v614_v39  ;;  %v254_v51 = vrot.slane %v249_v50, %v80_v11  ;;  %v258_v58 = vrot.slane %v249_v50, %v789_v29  ;;  %vm740_vm3 = vmmov 0   ;;  %v622_v3 = vld [vmem:[#allocation7 + $0x38] ss:$12 sps:$4 sm:$0xff]   ;;  %v623_v6 = vld [vmem:[#allocation7 + $0x20] ss:$12 sps:$4 sm:$0xff]   ;;  %vm522_vm4 = vcmask 31744  }
  0x3d   :  { %568 = vmatprep.subr.bf16.mxu1 %v739_v2  ;;  %v624_v8 = vld [vmem:[#allocation7 + $0x8] ss:$12 sps:$4 sm:$0xff]  }
  0x3e   :  { %v625_v9 = vld [vmem:[#allocation4 + $0x38] ss:$20 sps:$4 sm:$0xff]  }
  0x3f   :  { %319 = vmatpush1.bf16.msra.mxu0 %v612_v40 }
  0x40   :  { %320 = vmatprep.subr.bf16.mxu0 %v617_v41 }
  0x43   :  { %321 = vmatpush1.bf16.msra.mxu0 %v615_v42 }
  0x44   :  { %322 = vmatprep.subr.bf16.mxu0 %v620_v44 }
  0x47   :  { %323 = vmatpush1.bf16.msra.mxu0 %v618_v45 }
  0x48   :  { %580 = vmatprep.subr.bf16.mxu0 %v739_v2 }
  0xfa   :  { %v136_v14 = vpop.f32.mrf.mxu0 }
  0xfb   :  { %v137_v15 = vadd.f32 %v136_v14, %v81_v13 }
  0xfc   :  { %v786_v16 = vpop.f32.mrf.mxu0 }
  0xfd   :  { %v143_v17 = vmax.f32 %v137_v15, 0.0  ;;  %v139_v7 = vadd.f32 %v786_v16, %v85_v4  ;;  %v626_v16 = vld [vmem:[#allocation4 + $0x10] ss:$20 sps:$4 sm:$0xff]  }
  0xfe   :  { %v140_v18 = vpop.f32.mrf.mxu0 }
  0xff   :  { %v144_v19 = vpack.c.bf16 %v143_v17, %v143_v17  ;;  %v550_v17 = vld [vmem:[%s817_s4 + $0x2] ss:$0 sm:$0xff] }
 0x100   :  { %v141_v20 = vpop.f32.mrf.mxu0 }
 0x101   :  { %538 = vmatmul.mubr.msk.bf16.vlgmr.msra.gmra.mxu1 %vm181_vm1, %v144_v19 }
 0x102   :  { %576 = vmatprep.mubr.msk.bf16.mxu1 %vm740_vm3, %v739_v2  ;;  %569 = vmatpush3.bf16.msra.mxu1 %v621_v1 }
 0x103   :  { %570 = vmatprep.subr.bf16.mxu1 %v739_v2 }
 0x106   :  { %571 = vmatpush3.bf16.msra.mxu1 %v622_v3 }
 0x107   :  { %572 = vmatprep.subr.bf16.mxu1 %v739_v2 }
 0x10a   :  { %573 = vmatpush3.bf16.msra.mxu1 %v623_v6 }
 0x10b   :  { %574 = vmatprep.subr.bf16.mxu1 %v739_v2 }
 0x10e   :  { %575 = vmatpush3.bf16.msra.mxu1 %v624_v8 }
 0x1c1   :  { %v219_v23 = vpop.f32.mrf.mxu1 }
 0x1c2   :  { %v220_v24 = vadd.f32 %v219_v23, %v154_v22 }
 0x1c3   :  { %v221_v25 = vpop.f32.mrf.mxu1 }
 0x1c4   :  { %v539_v26 = vmul.f32 -1.442695, %v220_v24  ;;  %v222_v31 = vadd.f32 %v221_v25, %v158_v30  ;;  %v556_v25 = vld [vmem:[#allocation6 + $0x4] ss:$0 sm:$0xff] }
 0x1c5   :  { %v223_v27 = vpop.f32.mrf.mxu1 }
 0x1c6   :  { %627 = vpow2.f32 %v539_v26 }
 0x1c7   :  { %v224_v28 = vpop.f32.mrf.mxu1  ;;  %629 = vtanh.f32 %v222_v31 }
 0x1d3   :  { %v628_v32 = vpop.eup %627 }
 0x1d4   :  { %v229_v33 = vadd.f32 1.0, %v628_v32  ;;  %v630_v34 = vpop.eup %629 }
 0x1d6   :  { %631 = vrcp.f32 %v229_v33 }
 0x1e3   :  { %v632_v35 = vpop.eup %631 }
 0x1e4   :  { %v233_v36 = vmul.f32 %v632_v35, %v630_v34 }
 0x1e6   :  { %633 = vtanh.f32 %v233_v36 }
 0x1f3   :  { %v634_v43 = vpop.eup %633 }
 0x1f4   :  { %236 = vrot.lane.b32.xlu0 %v634_v43, %s738_s2 }
 0x266   :  { %v237_v46 = vpop.permute.xlu0 %236 }
 0x267   :  { %v239_v47 = vmul.f32 %v632_v35, %v237_v46 }
 0x269   :  { %v240_v48 = vpack.c.bf16 %v239_v47, %v239_v47 }
 0x26b   :  { %262 = vrot.lane.b32.xlu0 %v240_v48, %s738_s2 }
 0x2dd   :  { %v263_v49 = vpop.permute.xlu0 %262 }
 0x2de   :  { %548 = vmatmul.mubr.msk.bf16.vlgmr.msra.gmra.mxu0 %vm304_vm2, %v263_v49 }
 0x2df   :  { %584 = vmatprep.mubr.msk.bf16.mxu0 %vm740_vm3, %v739_v2  ;;  %581 = vmatpush3.bf16.msra.mxu0 %v625_v9 }
 0x2e0   :  { %582 = vmatprep.subr.bf16.mxu0 %v739_v2 }
 0x2e3   :  { %583 = vmatpush3.bf16.msra.mxu0 %v626_v16 }
 0x39e   :  { %v342_v52 = vpop.f32.mrf.mxu0 }
 0x39f   :  { %v343_v53 = vadd.f32 %v342_v52, %v254_v51 }
 0x3a0   :  { %v344_v54 = vpop.f32.mrf.mxu0 }
 0x3a1   :  { %v549_v55 = vmul.f32 -1.442695, %v343_v53  ;;  %v345_v59 = vadd.f32 %v344_v54, %v258_v58 }
 0x3a2   :  { %v346_v56 = vpop.f32.mrf.mxu0 }
 0x3a3   :  { %635 = vpow2.f32 %v549_v55 }
 0x3a4   :  { %v347_v57 = vpop.f32.mrf.mxu0  ;;  %637 = vtanh.f32 %v345_v59 }
 0x3b0   :  { %v636_v60 = vpop.eup %635 }
 0x3b1   :  { %v352_v61 = vadd.f32 1.0, %v636_v60  ;;  %v638_v62 = vpop.eup %637 }
 0x3b3   :  { %639 = vrcp.f32 %v352_v61 }
 0x3c0   :  { %v640_v63 = vpop.eup %639 }
 0x3c1   :  { %v356_v0 = vmul.f32 %v640_v63, %v638_v62 }
 0x3c3   :  { %641 = vtanh.f32 %v356_v0 }
 0x3d0   :  { %v642_v5 = vpop.eup %641 }
 0x3d1   :  { %359 = vrot.lane.b32.xlu1 %v642_v5, %s738_s2 }
 0x3d5   :  { %364 = vrot.lane.b32.xlu1 %v139_v7, %s738_s2 }
 0x443   :  { %v360_v10 = vpop.permute.xlu1 %359 }
 0x444   :  { %v362_v11 = vmul.f32 %v640_v63, %v360_v10 }
 0x447   :  { %v365_v12 = vpop.permute.xlu1 %364 }
 0x448   :  { %v367_v13 = vadd.f32 %v365_v12, %v362_v11 }
 0x44a   :  { %v368_v14 = vpack.c.bf16 %v367_v13, %v367_v13 }
 0x44c   :  { %385 = vrot.lane.b32.xlu0 %v368_v14, %s738_s2 }
 0x4be   :  { %v386_v15 = vpop.permute.xlu0 %385 }
 0x4bf   :  { %577 = vmatmul.mubr.msk.bf16.vlgmr.msra.gmra.mxu1 %vm304_vm2, %v386_v15 }
 0x57f   :  { %v448_v18 = vpop.f32.mrf.mxu1 }
 0x580   :  { %v449_v19 = vadd.f32 %v550_v17, %v448_v18 }
 0x581   :  { %v578_v20 = vpop.f32.mrf.mxu1 }
 0x582   :  { %v454_v21 = vmax.f32 %v449_v19, 0.0 }
 0x583   :  { %v451_v22 = vpop.f32.mrf.mxu1 }
 0x584   :  { %v455_v23 = vpack.c.bf16 %v454_v21, %v454_v21 }
 0x585   :  { %v579_v24 = vpop.f32.mrf.mxu1 }
 0x586   :  { %585 = vmatmul.mubr.msk.bf16.vlgmr.msra.gmra.mxu0 %vm181_vm1, %v455_v23 }
 0x646   :  { %v516_v26 = vpop.f32.mrf.mxu0 }
 0x647   :  { %v517_v27 = vadd.f32 %v556_v25, %v516_v26 }
 0x648   :  { %v586_v28 = vpop.f32.mrf.mxu0 }
 0x649   :  { %523 = vst.msk [vmem:[%s818_s5] sm:$0xff] %vm522_vm4, %v517_v27 }
 0x64a   :  { %v519_v29 = vpop.f32.mrf.mxu0 }
 0x64c   :  { %v587_v30 = vpop.f32.mrf.mxu0 }
 0x64d   :  { %528 = vsyncpa [#allocation3], 1 }
 0x64e   :  { %529 = vsyncpa [#allocation5], 1 }
 0x64f   :  { %530 = vsyncpa [#allocation8], 1 }

</bundles_post_ra>
